<compile_context>
chip_gen: v6e
topology: v6e:2x2x1
jax: 0.10.0
libtpu: 0.0.40
codegen_flags: <defaults>
</compile_context>

<pallas_src>
import functools

import jax
import jax.numpy as jnp
from jax import lax
from jax.experimental import pallas as pl
from jax.experimental.pallas import tpu as pltpu


def _round_up(x, m):
    return (x + m - 1) // m * m


def _pick_batch_tile(batch):
    """Adaptive batch tile.

    * tiny batches (<=32): one full-extent tile -- no padding, no wasted MXU
      rows, no wasted x DMA.
    * mid/large batches: >=2 grid steps (so the 'parallel' batch axis shards
      across v7x's two TensorCores), tiles a multiple of 16 rows (bf16 sublane
      packing after the in-kernel cast), capped at 512 rows to amortize the
      per-grid-step overhead while keeping VMEM in the low MiB.
    """
    if batch <= 32:
        return batch
    return min(512, _round_up(pl.cdiv(batch, 2), 16))


# -----------------------------------------------------------------------------
# Pallas kernel: fused linear1 -> Softplus -> linear2
# -----------------------------------------------------------------------------
def crc_forward_kernel(x_ref, w1_ref, b1_ref, w2_ref, b2_ref, o_ref,
                       *, beta, matmul_dtype, softplus_dtype):
    # x_ref:  (TB, Fp)  original dtype (f32); cast to bf16 in-kernel
    # w1_ref: (Hp, Fp)  bf16, nn.Linear layout (out_features, in_features)
    # b1_ref: (1, Hp)   f32
    # w2_ref: (Cp, Hp)  bf16, rows zero-padded to Cp = 128 lanes
    # b2_ref: (1, Cp)   f32
    # o_ref:  (TB, Cp)  f32, lane-dense output tile
    nt_dims = (((1,), (1,)), ((), ()))  # A @ B^T: MXU-native, no HBM transpose

    # linear1: bf16 operands (cast here, not in the wrapper), f32 accumulation
    x = x_ref[...].astype(matmul_dtype)
    h = lax.dot_general(x, w1_ref[...], nt_dims,
                        preferred_element_type=jnp.float32) + b1_ref[...]

    # custom Softplus (VPU + EUP).  |z| >= threshold mask dropped: the omitted
    # term log1p(exp(-|z|)) <= 2e-9 at the default threshold=20.
    z = h if beta == 1.0 else h * beta          # static skip when beta == 1
    z = z.astype(softplus_dtype)
    sp_neg = jnp.log1p(jnp.exp(-jnp.abs(z)))    # EUP chain
    act = jnp.maximum(z, 0.0) + sp_neg          # == where(z>=0, z+sp, sp)
    if beta != 1.0:
        act = act * (1.0 / beta)

    # linear2: lane-dense (TB, Cp) result, padded C columns are exactly 0
    logits = lax.dot_general(act.astype(w2_ref.dtype), w2_ref[...], nt_dims,
                             preferred_element_type=jnp.float32) + b2_ref[...]
    o_ref[...] = logits.astype(o_ref.dtype)


# -----------------------------------------------------------------------------
# One-time parameter preparation (hoisted out of the per-forward path)
# -----------------------------------------------------------------------------
def prepare_params(w1, b1, w2, b2, matmul_dtype=jnp.bfloat16):
    """Pad/cast the weights and biases ONCE; reuse the result across forwards.

    Zero padding keeps results exact: padded F columns contribute 0 to h,
    padded H columns of W2 are zero rows so the (nonzero) softplus of the
    padded hidden units never reaches the logits, padded C columns are 0 and
    sliced off in the wrapper.
    """
    H, F = w1.shape
    C = w2.shape[0]
    Fp, Hp, Cp = _round_up(F, 128), _round_up(H, 128), _round_up(C, 128)

    def pad2(a, rows, cols):
        if a.shape == (rows, cols):   # skip the pad when already aligned
            return a
        return jnp.zeros((rows, cols), a.dtype).at[:a.shape[0], :a.shape[1]].set(a)

    w1_p = pad2(w1.astype(matmul_dtype), Hp, Fp)
    w2_p = pad2(w2.astype(matmul_dtype), Cp, Hp)
    b1_p = pad2(b1.astype(jnp.float32).reshape(1, H), 1, Hp)
    b2_p = pad2(b2.astype(jnp.float32).reshape(1, C), 1, Cp)
    return w1_p, b1_p, w2_p, b2_p


# -----------------------------------------------------------------------------
# Forward wrapper: flatten, (maybe) pad x, set BlockSpecs / grid, slice back
# -----------------------------------------------------------------------------
def crc_full_forward(features, w1_p, b1_p, w2_p, b2_p, *, num_classes,
                     beta=1.0, threshold=20.0, matmul_dtype=jnp.bfloat16,
                     softplus_dtype=jnp.float32, batch_tile=None):
    del threshold  # see Softplus comment in the kernel (deviation <= 2e-9/beta)
    B = features.shape[0]
    x = features.reshape(B, -1)                 # row-major == torch.flatten
    F_dim = x.shape[1]
    Hp, Fp = w1_p.shape
    Cp = w2_p.shape[0]

    if batch_tile is None:
        batch_tile = _pick_batch_tile(B)
    Bp = _round_up(B, batch_tile)

    # x is streamed in its ORIGINAL dtype (cast to bf16 happens in-kernel), and
    # is only copied here when padding is actually required.
    if Bp != B or Fp != F_dim:
        x = jnp.pad(x, ((0, Bp - B), (0, Fp - F_dim)))

    grid = (Bp // batch_tile,)
    kernel = functools.partial(crc_forward_kernel, beta=beta,
                               matmul_dtype=matmul_dtype,
                               softplus_dtype=softplus_dtype)

    out = pl.pallas_call(
        kernel,
        out_shape=jax.ShapeDtypeStruct((Bp, Cp), jnp.float32),
        grid_spec=pltpu.PrefetchScalarGridSpec(
            num_scalar_prefetch=0,
            grid=grid,
            in_specs=[
                pl.BlockSpec((batch_tile, Fp), lambda i: (i, 0)),   # x tile
                pl.BlockSpec((Hp, Fp), lambda i: (0, 0)),           # W1 (const)
                pl.BlockSpec((1, Hp), lambda i: (0, 0)),            # b1 (const)
                pl.BlockSpec((Cp, Hp), lambda i: (0, 0)),           # W2 (const)
                pl.BlockSpec((1, Cp), lambda i: (0, 0)),            # b2 (const)
            ],
            out_specs=pl.BlockSpec((batch_tile, Cp), lambda i: (i, 0)),
        ),
        compiler_params=pltpu.CompilerParams(
            # Batch tiles are independent; with >=2 grid steps (mid/large B)
            # this shards across v7x's two TensorCores.
            dimension_semantics=("parallel",),
        ),
    )(x, w1_p, b1_p, w2_p, b2_p)

    return out[:B, :num_classes]


# -----------------------------------------------------------------------------
# Pure-JAX reference of the torch forward (for correctness check)
# -----------------------------------------------------------------------------
def reference_forward(features, w1, b1, w2, b2, beta=1.0, threshold=20.0,
                      matmul_dtype=jnp.float32):
    x = features.reshape(features.shape[0], -1).astype(matmul_dtype)
    h = jnp.dot(x, w1.astype(matmul_dtype).T,
                preferred_element_type=jnp.float32) + b1.astype(jnp.float32)
    z = beta * h
    abs_z = jnp.abs(z)
    eval_neg = jnp.where(abs_z < threshold, jnp.log1p(jnp.exp(-abs_z)), 0.0)
    act = jnp.where(z >= 0, z + eval_neg, eval_neg) / beta
    return jnp.dot(act.astype(matmul_dtype), w2.astype(matmul_dtype).T,
                   preferred_element_type=jnp.float32) + b2.astype(jnp.float32)


if __name__ == "__main__":
    # CRC_Full(num_features=C*H*W, num_classes=10, num_hidden=128).
    # TODO(synk): Softplus.gradient / hessian / local_hessian_bound and the
    # certificate machinery are training/analysis-only (not part of forward())
    # and are intentionally not implemented here.
    B, C_in, H_sp, W_sp = 2, 4, 16, 16
    num_features = C_in * H_sp * W_sp          # 1024
    num_hidden = 128
    num_classes = 10

    key = jax.random.PRNGKey(0)
    kx, kw1, kb1, kw2, kb2 = jax.random.split(key, 5)

    features = jax.random.normal(kx, (B, C_in, H_sp, W_sp), dtype=jnp.float32)

    bound1 = 1.0 / (num_features ** 0.5)
    w1 = jax.random.uniform(kw1, (num_hidden, num_features), jnp.float32,
                            -bound1, bound1)
    b1 = jax.random.uniform(kb1, (num_hidden,), jnp.float32, -bound1, bound1)
    bound2 = 1.0 / (num_hidden ** 0.5)
    w2 = jax.random.uniform(kw2, (num_classes, num_hidden), jnp.float32,
                            -bound2, bound2)
    b2 = jax.random.uniform(kb2, (num_classes,), jnp.float32, -bound2, bound2)

    # One-time weight/bias prep (padding + bf16 cast hoisted out of forward).
    params = prepare_params(w1, b1, w2, b2)

    fwd = jax.jit(functools.partial(crc_full_forward, num_classes=num_classes,
                                    beta=1.0, threshold=20.0))
    logits = jax.block_until_ready(fwd(features, *params))
    assert logits.shape == (B, num_classes)

    # Tight check vs. a reference that uses the same bf16 matmul operands.
    ref_bf16 = reference_forward(features, w1, b1, w2, b2,
                                 matmul_dtype=jnp.bfloat16)
    assert jnp.allclose(logits, ref_bf16, atol=2e-3, rtol=2e-3), \
        "mismatch vs bf16-operand reference"

    # Loose check vs. the full-f32 module semantics (bf16 operand rounding).
    ref_f32 = reference_forward(features, w1, b1, w2, b2,
                                matmul_dtype=jnp.float32)
    assert jnp.allclose(logits, ref_f32, atol=5e-2, rtol=5e-2), \
        "mismatch vs f32 reference"

    print("KERNEL_OK")
</pallas_src>

<mosaic_0001>
module attributes {stable_mosaic.version = 11 : i64} {
  func.func @crc_forward_kernel(%arg0: i32, %arg1: memref<2x1024xf32, #tpu.memory_space<vmem>>, %arg2: memref<128x1024xbf16, #tpu.memory_space<vmem>>, %arg3: memref<1x128xf32, #tpu.memory_space<vmem>>, %arg4: memref<128x128xbf16, #tpu.memory_space<vmem>>, %arg5: memref<1x128xf32, #tpu.memory_space<vmem>>, %arg6: memref<2x128xf32, #tpu.memory_space<vmem>>) attributes {dimension_semantics = [#tpu.dimension_semantics<parallel>], iteration_bounds = array<i64: 1>, scalar_prefetch = 0 : i64, scratch_operands = 0 : i64, tpu.core_type = #tpu.core_type<tc>, window_params = [{transform_indices = @transform_0, window_bounds = array<i64: 2, 1024>}, {pipeline_mode = #tpu.pipeline_mode<synchronous>, transform_indices = @transform_1, window_bounds = array<i64: 128, 1024>}, {pipeline_mode = #tpu.pipeline_mode<synchronous>, transform_indices = @transform_2, window_bounds = array<i64: 1, 128>}, {pipeline_mode = #tpu.pipeline_mode<synchronous>, transform_indices = @transform_3, window_bounds = array<i64: 128, 128>}, {pipeline_mode = #tpu.pipeline_mode<synchronous>, transform_indices = @transform_4, window_bounds = array<i64: 1, 128>}, {transform_indices = @transform_5, window_bounds = array<i64: 2, 128>}]} {
    %c0 = arith.constant 0 : index
    %c0_0 = arith.constant 0 : index
    %0 = vector.load %arg1[%c0, %c0_0] : memref<2x1024xf32, #tpu.memory_space<vmem>>, vector<2x1024xf32>
    %1 = arith.truncf %0 : vector<2x1024xf32> to vector<2x1024xbf16>
    %c0_1 = arith.constant 0 : index
    %c0_2 = arith.constant 0 : index
    %2 = vector.load %arg2[%c0_1, %c0_2] : memref<128x1024xbf16, #tpu.memory_space<vmem>>, vector<128x1024xbf16>
    %cst = arith.constant dense<0.000000e+00> : vector<2x128xf32>
    %3 = tpu.matmul %1, %2, %cst {dimension_numbers = #tpu.dot_dimension_numbers<[1], [1], [0], [0], [0, 0, 1, 0], [], []>} : vector<2x1024xbf16>, vector<128x1024xbf16>, vector<2x128xf32> -> vector<2x128xf32>
    %c0_3 = arith.constant 0 : index
    %c0_4 = arith.constant 0 : index
    %4 = vector.load %arg3[%c0_3, %c0_4] : memref<1x128xf32, #tpu.memory_space<vmem>>, vector<1x128xf32>
    %5 = vector.broadcast %4 : vector<1x128xf32> to vector<2x128xf32>
    %6 = arith.addf %3, %5 : vector<2x128xf32>
    %7 = math.absf %6 : vector<2x128xf32>
    %cst_5 = arith.constant 0.000000e+00 : f32
    %8 = vector.broadcast %cst_5 : f32 to vector<2x128xf32>
    %9 = arith.subf %8, %7 : vector<2x128xf32>
    %10 = math.exp %9 : vector<2x128xf32>
    %11 = math.log1p %10 : vector<2x128xf32>
    %cst_6 = arith.constant 0.000000e+00 : f32
    %12 = vector.broadcast %cst_6 : f32 to vector<2x128xf32>
    %13 = arith.maximumf %6, %12 : vector<2x128xf32>
    %14 = arith.addf %13, %11 : vector<2x128xf32>
    %15 = arith.truncf %14 : vector<2x128xf32> to vector<2x128xbf16>
    %c0_7 = arith.constant 0 : index
    %c0_8 = arith.constant 0 : index
    %16 = vector.load %arg4[%c0_7, %c0_8] : memref<128x128xbf16, #tpu.memory_space<vmem>>, vector<128x128xbf16>
    %cst_9 = arith.constant dense<0.000000e+00> : vector<2x128xf32>
    %17 = tpu.matmul %15, %16, %cst_9 {dimension_numbers = #tpu.dot_dimension_numbers<[1], [1], [0], [0], [0, 0, 1, 0], [], []>} : vector<2x128xbf16>, vector<128x128xbf16>, vector<2x128xf32> -> vector<2x128xf32>
    %c0_10 = arith.constant 0 : index
    %c0_11 = arith.constant 0 : index
    %18 = vector.load %arg5[%c0_10, %c0_11] : memref<1x128xf32, #tpu.memory_space<vmem>>, vector<1x128xf32>
    %19 = vector.broadcast %18 : vector<1x128xf32> to vector<2x128xf32>
    %20 = arith.addf %17, %19 : vector<2x128xf32>
    %c0_12 = arith.constant 0 : index
    %c0_13 = arith.constant 0 : index
    %21 = vector.load %arg6[%c0_12, %c0_13] : memref<2x128xf32, #tpu.memory_space<vmem>>, vector<2x128xf32>
    tpu.vector_store %arg6[%c0_12, %c0_13], %20 {strides = array<i32>} : memref<2x128xf32, #tpu.memory_space<vmem>>, vector<2x128xf32>,
    return
  }
  func.func @transform_0(%arg0: i32) -> (i32, i32) {
    %c0_i32 = arith.constant 0 : i32
    %c0_i32_0 = arith.constant 0 : i32
    return %arg0, %c0_i32 : i32, i32
  }
  func.func @transform_1(%arg0: i32) -> (i32, i32) {
    %c0_i32 = arith.constant 0 : i32
    %c0_i32_0 = arith.constant 0 : i32
    %c0_i32_1 = arith.constant 0 : i32
    return %c0_i32, %c0_i32_0 : i32, i32
  }
  func.func @transform_2(%arg0: i32) -> (i32, i32) {
    %c0_i32 = arith.constant 0 : i32
    %c0_i32_0 = arith.constant 0 : i32
    %c0_i32_1 = arith.constant 0 : i32
    return %c0_i32, %c0_i32_0 : i32, i32
  }
  func.func @transform_3(%arg0: i32) -> (i32, i32) {
    %c0_i32 = arith.constant 0 : i32
    %c0_i32_0 = arith.constant 0 : i32
    %c0_i32_1 = arith.constant 0 : i32
    return %c0_i32, %c0_i32_0 : i32, i32
  }
  func.func @transform_4(%arg0: i32) -> (i32, i32) {
    %c0_i32 = arith.constant 0 : i32
    %c0_i32_0 = arith.constant 0 : i32
    %c0_i32_1 = arith.constant 0 : i32
    return %c0_i32, %c0_i32_0 : i32, i32
  }
  func.func @transform_5(%arg0: i32) -> (i32, i32) {
    %c0_i32 = arith.constant 0 : i32
    %c0_i32_0 = arith.constant 0 : i32
    return %arg0, %c0_i32 : i32, i32
  }
}

</mosaic_0001>

<bundles_post_ra>
// kernel: crc_full_forward.1
= control target key start
LH: loop header
LB: loop body
LE: loop exit
PB: predicated region body
PF: predicated region fallthrough
CT: control target
= control target key end

     0   :  { %10 = vsyncpa [#allocation3], 0  ;;  %s1061_s0 = inlined_call_operand.vmem [shape: f32[2,1024], index: 0, kind: input, shape index: {}]   ;;  %s1062_s1 = inlined_call_operand.hbm [shape: bf16[128,1024], index: 1, kind: input, shape index: {}]   ;;  %s1063_s2 = inlined_call_operand.vmem [shape: f32[1,128], index: 2, kind: input, shape index: {}]   ;;  %s1064_s3 = inlined_call_operand.vmem [shape: bf16[128,128], index: 3, kind: input, shape index: {}]   ;;  %s1065_s4 = inlined_call_operand.vmem [shape: f32[1,128], index: 4, kind: input, shape index: {}]   ;;  %s1066_s5 = inlined_call_operand.hbm [shape: f32[2,128], index: 5, kind: output, shape index: {}]  }
   0x1   :  { %11 = vsyncpa [#allocation4], 0  ;;  %s952_s18 = smov [#allocation2]  }
   0x2   :  { %s19_s19 = sshll.u32 %s952_s18, 4  ;;  %s20_s19 = int_to_ptr.vmem [resolvable:$true] %s19_s19 }
   0x3   :  { %s916_s20 = scalar_lea.vmem %s20_s19, 8192  ;;  %p921_p1 = scmp.lt.s32.totalorder %s20_s19, %s20_s19 }
   0x4   :  { %p917_p0 = scmp.ne.s32.totalorder %s20_s19, %s916_s20  ;;  %p922_p2 = scmp.lt.s32.totalorder %s916_s20, %s916_s20 }
   0x6   :  { %p923_p3 = por %p922_p2, %p921_p1 }
   0x8   :  { %p924_p4 = pnand %p923_p3, %p917_p0 }
   0xa   :  { %927 = shalt.err (!%p924_p4)
}
   0xb   :  { %s953_s21 = smov 512   ;;  %s954_s22 = smov 32  }
   0xc   :  { %25 = dma.hbm_to_vmem [thread:$0]  %s1062_s1, 8192, %s20_s19, [#allocation3], %s953_s21, %s953_s21, %s954_s22  }
   0xd   :  { %948 = dma.done.wait [#allocation3], 8192  }
   0xe   :  { %949 = vsyncadd [#allocation3], 4294959104  ;;  %v955_v0 = vmov 1983009808   ;;  %v44_v2 = vlaneseq  ;;  %v146_v3 = vld [vmem:[#allocation2 + $0x1c0] sm:$0xff]  ;;  %v147_v5 = vld [vmem:[#allocation2 + $0x1c8] sm:$0xff] }
   0xf   :  { %v42_v1 = vunpack.c.l.s4 %v955_v0  ;;  %v150_v4 = vld [vmem:[#allocation2 + $0x1e0] sm:$0xff]  ;;  %v151_v7 = vld [vmem:[#allocation2 + $0x1e8] sm:$0xff]  ;;  %vm957_vm0 = vmmov 0   ;;  %s958_s20 = smov [#allocation5]  }
  0x10   :  { %v842_v6 = vcombine.high %v146_v3, %v150_v4  ;;  %v841_v8 = vcombine.low %v146_v3, %v150_v4  ;;  %v138_v9 = vld [vmem:[#allocation2 + $0x180] sm:$0xff]  ;;  %v844_v11 = vcombine.high %v147_v5, %v151_v7  ;;  %v843_v12 = vcombine.low %v147_v5, %v151_v7  ;;  %v139_v14 = vld [vmem:[#allocation2 + $0x188] sm:$0xff]  ;;  %s775_s21 = sshll.u32 %s958_s20, 4  ;;  %s776_s21 = int_to_ptr.vmem [resolvable:$true] %s775_s21 }
  0x11   :  { %v142_v10 = vld [vmem:[#allocation2 + $0x1a0] sm:$0xff]  ;;  %v143_v15 = vld [vmem:[#allocation2 + $0x1a8] sm:$0xff]  ;;  %v43_v17 = vunpack.c.0.s8 %v42_v1  ;;  %v45_v18 = vshrl.u32 %v44_v2, 7  ;;  %s928_s22 = scalar_lea.vmem %s776_s21, 32  ;;  %p933_p6 = scmp.lt.s32.totalorder %s776_s21, %s776_s21 }
  0x12   :  { %v834_v13 = vcombine.high %v138_v9, %v142_v10  ;;  %481 = vmatprep.subr.bf16.mxu0 %v842_v6  ;;  %v836_v16 = vcombine.high %v139_v14, %v143_v15  ;;  %521 = vmatprep.subr.bf16.mxu1 %v844_v11  ;;  %v130_v19 = vld [vmem:[#allocation2 + $0x140] sm:$0xff]  ;;  %v131_v21 = vld [vmem:[#allocation2 + $0x148] sm:$0xff]  ;;  %v833_v24 = vcombine.low %v138_v9, %v142_v10  ;;  %p929_p5 = scmp.ne.s32.totalorder %s776_s21, %s928_s22  ;;  %p934_p7 = scmp.lt.s32.totalorder %s928_s22, %s928_s22 }
  0x13   :  { %482 = vmatpush1.bf16.xpose.msra.mxu0 %v841_v8  ;;  %522 = vmatpush1.bf16.xpose.msra.mxu1 %v843_v12  ;;  %v134_v20 = vld [vmem:[#allocation2 + $0x160] sm:$0xff]  ;;  %v135_v22 = vld [vmem:[#allocation2 + $0x168] sm:$0xff]  ;;  %v992_v23 = vsub.s32 %v43_v17, %v45_v18  ;;  %v835_v25 = vcombine.low %v139_v14, %v143_v15  ;;  %v152_v14 = vld [vmem:[#allocation2 + $0x1f0] sm:$0xff] }
  0x14   :  { %483 = vmatprep.subr.bf16.mxu0 %v834_v13  ;;  %523 = vmatprep.subr.bf16.mxu1 %v836_v16  ;;  %v826_v26 = vcombine.high %v130_v19, %v134_v20  ;;  %v828_v27 = vcombine.high %v131_v21, %v135_v22  ;;  %v36_v28 = vld [vmem:[%s1061_s0] sm:$0xff]  ;;  %v123_v35 = vld [vmem:[#allocation2 + $0x108] sm:$0xff]  ;;  %v825_v39 = vcombine.low %v130_v19, %v134_v20  ;;  %v148_v13 = vld [vmem:[#allocation2 + $0x1d0] sm:$0xff]  ;;  %p935_p8 = por %p934_p7, %p933_p6 }
  0x15   :  { %v998_v29 = vrot.slane %v36_v28, %v992_v23  ;;  %v40_v30 = vcombine.high %v36_v28, %v36_v28  ;;  %v122_v33 = vld [vmem:[#allocation2 + $0x100] sm:$0xff]  ;;  %v127_v36 = vld [vmem:[#allocation2 + $0x128] sm:$0xff]  ;;  %v827_v40 = vcombine.low %v131_v21, %v135_v22  ;;  %v149_v15 = vld [vmem:[#allocation2 + $0x1d8] sm:$0xff]  ;;  %v846_v20 = vcombine.high %v148_v13, %v152_v14 }
  0x16   :  { %v126_v34 = vld [vmem:[#allocation2 + $0x120] sm:$0xff]  ;;  %v820_v43 = vcombine.high %v123_v35, %v127_v36  ;;  %v115_v46 = vld [vmem:[#allocation2 + $0xc8] sm:$0xff]  ;;  %v819_v49 = vcombine.low %v123_v35, %v127_v36  ;;  %v153_v16 = vld [vmem:[#allocation2 + $0x1f8] sm:$0xff]  ;;  %p936_p9 = pnand %p935_p8, %p929_p5 }
  0x17   :  { %v55_v31 = vcombine.high %v998_v29, %v998_v29  ;;  %v1003_v32 = vrot.slane %v40_v30, %v992_v23  ;;  %v818_v41 = vcombine.high %v122_v33, %v126_v34  ;;  %v114_v44 = vld [vmem:[#allocation2 + $0xc0] sm:$0xff]  ;;  %v119_v47 = vld [vmem:[#allocation2 + $0xe8] sm:$0xff]  ;;  %v817_v48 = vcombine.low %v122_v33, %v126_v34  ;;  %v141_v30 = vld [vmem:[#allocation2 + $0x198] sm:$0xff] }
  0x18   :  { %v118_v45 = vld [vmem:[#allocation2 + $0xe0] sm:$0xff]  ;;  %v812_v51 = vcombine.high %v115_v46, %v119_v47  ;;  %v107_v54 = vld [vmem:[#allocation2 + $0x88] sm:$0xff]  ;;  %v811_v57 = vcombine.low %v115_v46, %v119_v47  ;;  %v848_v21 = vcombine.high %v149_v15, %v153_v16  ;;  %v82_v28 = vpack.c.bf16 %v998_v29, %v998_v29  ;;  %v132_v29 = vld [vmem:[#allocation2 + $0x150] sm:$0xff] }
  0x19   :  { %v83_v37 = vpack.c.bf16 %v55_v31, %v55_v31  ;;  %v56_v38 = vcombine.high %v1003_v32, %v1003_v32  ;;  %v810_v50 = vcombine.high %v114_v44, %v118_v45  ;;  %v106_v52 = vld [vmem:[#allocation2 + $0x80] sm:$0xff]  ;;  %v111_v55 = vld [vmem:[#allocation2 + $0xa8] sm:$0xff]  ;;  %v809_v56 = vcombine.low %v114_v44, %v118_v45  ;;  %v145_v31 = vld [vmem:[#allocation2 + $0x1b8] sm:$0xff] }
  0x1a   :  { %v110_v53 = vld [vmem:[#allocation2 + $0xa0] sm:$0xff]  ;;  %v804_v59 = vcombine.high %v107_v54, %v111_v55  ;;  %v99_v62 = vld [vmem:[#allocation2 + $0x48] sm:$0xff]  ;;  %v803_v1 = vcombine.low %v107_v54, %v111_v55  ;;  %v845_v34 = vcombine.low %v148_v13, %v152_v14  ;;  %v847_v35 = vcombine.low %v149_v15, %v153_v16  ;;  %v124_v46 = vld [vmem:[#allocation2 + $0x110] sm:$0xff] }
  0x1b   :  { %484 = vmatpush1.bf16.xpose.msra.mxu0 %v833_v24  ;;  %524 = vmatpush1.bf16.xpose.msra.mxu1 %v835_v25  ;;  %v85_v42 = vpack.c.bf16 %v56_v38, %v56_v38  ;;  %v802_v58 = vcombine.high %v106_v52, %v110_v53  ;;  %v98_v60 = vld [vmem:[#allocation2 + $0x40] sm:$0xff]  ;;  %v103_v63 = vld [vmem:[#allocation2 + $0x68] sm:$0xff]  ;;  %v801_v0 = vcombine.low %v106_v52, %v110_v53  ;;  %v140_v25 = vld [vmem:[#allocation2 + $0x190] sm:$0xff] }
  0x1c   :  { %485 = vmatprep.subr.bf16.mxu0 %v826_v26  ;;  %525 = vmatprep.subr.bf16.mxu1 %v828_v27  ;;  %v102_v61 = vld [vmem:[#allocation2 + $0x60] sm:$0xff]  ;;  %v796_v3 = vcombine.high %v99_v62, %v103_v63  ;;  %v91_v6 = vld [vmem:[#allocation2 + $0x8] sm:$0xff]  ;;  %v795_v9 = vcombine.low %v99_v62, %v103_v63  ;;  %v144_v26 = vld [vmem:[#allocation2 + $0x1b0] sm:$0xff] }
  0x1d   :  { %513 = vmatprep.mubr.bf16.mxu0 %v83_v37  ;;  %553 = vmatprep.mubr.bf16.mxu1 %v85_v42  ;;  %v794_v2 = vcombine.high %v98_v60, %v102_v61  ;;  %v90_v4 = vld [vmem:[#allocation2] sm:$0xff]  ;;  %v95_v7 = vld [vmem:[#allocation2 + $0x28] sm:$0xff]  ;;  %v793_v8 = vcombine.low %v98_v60, %v102_v61  ;;  %v838_v36 = vcombine.high %v140_v25, %v144_v26  ;;  %v137_v42 = vld [vmem:[#allocation2 + $0x178] sm:$0xff] }
  0x1e   :  { %v94_v5 = vld [vmem:[#allocation2 + $0x20] sm:$0xff]  ;;  %v788_v11 = vcombine.high %v91_v6, %v95_v7  ;;  %v37_v12 = vld [vmem:[%s1061_s0 + $0x8] sm:$0xff]  ;;  %v787_v19 = vcombine.low %v91_v6, %v95_v7  ;;  %v840_v37 = vcombine.high %v141_v30, %v145_v31  ;;  %v128_v47 = vld [vmem:[#allocation2 + $0x130] sm:$0xff] }
  0x1f   :  { %v786_v10 = vcombine.high %v90_v4, %v94_v5  ;;  %v57_v17 = vcombine.high %v37_v12, %v37_v12  ;;  %v785_v18 = vcombine.low %v90_v4, %v94_v5  ;;  %v1011_v22 = vrot.slane %v37_v12, %v992_v23  ;;  %v116_v54 = vld [vmem:[#allocation2 + $0xd0] sm:$0xff]  ;;  %v93_v16 = vld [vmem:[#allocation2 + $0x18] sm:$0xff] }
  0x20   :  { %v822_v52 = vcombine.high %v124_v46, %v128_v47  ;;  %v120_v55 = vld [vmem:[#allocation2 + $0xf0] sm:$0xff] }
  0x21   :  { %v1014_v24 = vrot.slane %v57_v17, %v992_v23  ;;  %v72_v27 = vcombine.high %v1011_v22, %v1011_v22  ;;  %v84_v23 = vpack.c.bf16 %v1003_v32, %v1003_v32  ;;  %v839_v32 = vcombine.low %v141_v30, %v145_v31  ;;  %v108_v62 = vld [vmem:[#allocation2 + $0x90] sm:$0xff]  ;;  %v97_v17 = vld [vmem:[#allocation2 + $0x38] sm:$0xff] }
  0x22   :  { %v814_v60 = vcombine.high %v116_v54, %v120_v55  ;;  %v112_v63 = vld [vmem:[#allocation2 + $0xb0] sm:$0xff]  ;;  %v896_v30 = vld [vmem:[%s1064_s3 + $0x38] sm:$0xff]   ;;  %v956_v31 = vmov 0.0  }
  0x23   :  { %486 = vmatpush1.bf16.xpose.msra.mxu0 %v825_v39  ;;  %526 = vmatpush1.bf16.xpose.msra.mxu1 %v827_v40  ;;  %v73_v33 = vcombine.high %v1014_v24, %v1014_v24  ;;  %v87_v38 = vpack.c.bf16 %v72_v27, %v72_v27  ;;  %v136_v40 = vld [vmem:[#allocation2 + $0x170] sm:$0xff]  ;;  %v806_v4 = vcombine.high %v108_v62, %v112_v63 }
  0x24   :  { %487 = vmatprep.subr.bf16.mxu0 %v818_v41  ;;  %527 = vmatprep.subr.bf16.mxu1 %v820_v43  ;;  %v133_v41 = vld [vmem:[#allocation2 + $0x158] sm:$0xff]  ;;  %v837_v43 = vcombine.low %v140_v25, %v144_v26  ;;  %v830_v44 = vcombine.high %v132_v29, %v136_v40  ;;  %v100_v6 = vld [vmem:[#allocation2 + $0x50] sm:$0xff]  ;;  %v791_v26 = vcombine.low %v93_v16, %v97_v17 }
  0x25   :  { %v89_v39 = vpack.c.bf16 %v73_v33, %v73_v33  ;;  %v832_v45 = vcombine.high %v133_v41, %v137_v42  ;;  %v104_v7 = vld [vmem:[#allocation2 + $0x70] sm:$0xff]  ;;  %v86_v27 = vpack.c.bf16 %v1011_v22, %v1011_v22  ;;  %v898_v22 = vld [vmem:[%s1064_s3 + $0x28] sm:$0xff]  }
  0x26   :  { %v798_v12 = vcombine.high %v100_v6, %v104_v7  ;;  %v92_v14 = vld [vmem:[#allocation2 + $0x10] sm:$0xff] }
  0x27   :  { %v96_v15 = vld [vmem:[#allocation2 + $0x30] sm:$0xff] }
  0x28   :  { %v789_v25 = vcombine.low %v92_v14, %v96_v15  ;;  %v897_v33 = vld [vmem:[%s1064_s3 + $0x30] sm:$0xff]  }
  0x2b   :  { %488 = vmatpush1.bf16.xpose.msra.mxu0 %v817_v48  ;;  %528 = vmatpush1.bf16.xpose.msra.mxu1 %v819_v49  ;;  %v125_v48 = vld [vmem:[#allocation2 + $0x118] sm:$0xff] }
  0x2c   :  { %489 = vmatprep.subr.bf16.mxu0 %v810_v50  ;;  %529 = vmatprep.subr.bf16.mxu1 %v812_v51  ;;  %v129_v49 = vld [vmem:[#allocation2 + $0x138] sm:$0xff]  ;;  %v829_v50 = vcombine.low %v132_v29, %v136_v40  ;;  %v831_v51 = vcombine.low %v133_v41, %v137_v42 }
  0x2d   :  { %v824_v53 = vcombine.high %v125_v48, %v129_v49 }
  0x33   :  { %490 = vmatpush1.bf16.xpose.msra.mxu0 %v809_v56  ;;  %530 = vmatpush1.bf16.xpose.msra.mxu1 %v811_v57  ;;  %v117_v56 = vld [vmem:[#allocation2 + $0xd8] sm:$0xff] }
  0x34   :  { %491 = vmatprep.subr.bf16.mxu0 %v802_v58  ;;  %531 = vmatprep.subr.bf16.mxu1 %v804_v59  ;;  %v121_v57 = vld [vmem:[#allocation2 + $0xf8] sm:$0xff]  ;;  %v821_v58 = vcombine.low %v124_v46, %v128_v47  ;;  %v823_v59 = vcombine.low %v125_v48, %v129_v49 }
  0x35   :  { %v816_v61 = vcombine.high %v117_v56, %v121_v57 }
  0x3b   :  { %492 = vmatpush1.bf16.xpose.msra.mxu0 %v801_v0  ;;  %532 = vmatpush1.bf16.xpose.msra.mxu1 %v803_v1  ;;  %v109_v0 = vld [vmem:[#allocation2 + $0x98] sm:$0xff] }
  0x3c   :  { %493 = vmatprep.subr.bf16.mxu0 %v794_v2  ;;  %533 = vmatprep.subr.bf16.mxu1 %v796_v3  ;;  %v113_v1 = vld [vmem:[#allocation2 + $0xb8] sm:$0xff]  ;;  %v813_v2 = vcombine.low %v116_v54, %v120_v55  ;;  %v815_v3 = vcombine.low %v117_v56, %v121_v57 }
  0x3d   :  { %v808_v5 = vcombine.high %v109_v0, %v113_v1 }
  0x43   :  { %494 = vmatpush1.bf16.xpose.msra.mxu0 %v793_v8  ;;  %534 = vmatpush1.bf16.xpose.msra.mxu1 %v795_v9  ;;  %v101_v8 = vld [vmem:[#allocation2 + $0x58] sm:$0xff] }
  0x44   :  { %495 = vmatprep.subr.bf16.mxu0 %v786_v10  ;;  %535 = vmatprep.subr.bf16.mxu1 %v788_v11  ;;  %v105_v9 = vld [vmem:[#allocation2 + $0x78] sm:$0xff]  ;;  %v805_v10 = vcombine.low %v108_v62, %v112_v63  ;;  %v807_v11 = vcombine.low %v109_v0, %v113_v1 }
  0x45   :  { %v800_v13 = vcombine.high %v101_v8, %v105_v9 }
  0x4b   :  { %496 = vmatpush1.bf16.xpose.msra.mxu0 %v785_v18  ;;  %536 = vmatpush1.bf16.xpose.msra.mxu1 %v787_v19  ;;  %v797_v18 = vcombine.low %v100_v6, %v104_v7  ;;  %v799_v19 = vcombine.low %v101_v8, %v105_v9  ;;  %v849_v7 = vld [vmem:[%s1065_s4] ss:$0 sm:$0xff] }
  0x4c   :  { %561 = vmatprep.subr.bf16.mxu0 %v846_v20  ;;  %601 = vmatprep.subr.bf16.mxu1 %v848_v21  ;;  %v790_v20 = vcombine.high %v92_v14, %v96_v15  ;;  %v792_v21 = vcombine.high %v93_v16, %v97_v17 }
  0x52   :  { %514 = vmatmul.mubr.bf16.vlgmr.msra.gmra.mxu0 %v82_v28  ;;  %554 = vmatmul.mubr.bf16.vlgmr.msra.gmra.mxu1 %v84_v23  ;;  %v88_v28 = vpack.c.bf16 %v1014_v24, %v1014_v24  ;;  %v899_v24 = vld [vmem:[%s1064_s3 + $0x20] sm:$0xff]   ;;  %v900_v23 = vld [vmem:[%s1064_s3 + $0x18] sm:$0xff]  }
  0x53   :  { %562 = vmatpush1.bf16.xpose.msra.mxu0 %v845_v34  ;;  %602 = vmatpush1.bf16.xpose.msra.mxu1 %v847_v35  ;;  %v901_v34 = vld [vmem:[%s1064_s3 + $0x10] sm:$0xff]   ;;  %v902_v35 = vld [vmem:[%s1064_s3 + $0x8] sm:$0xff]  }
  0x54   :  { %563 = vmatprep.subr.bf16.mxu0 %v838_v36  ;;  %603 = vmatprep.subr.bf16.mxu1 %v840_v37  ;;  %v903_v36 = vld [vmem:[%s1064_s3] sm:$0xff]  }
  0x55   :  { %593 = vmatprep.mubr.bf16.mxu0 %v87_v38  ;;  %633 = vmatprep.mubr.bf16.mxu1 %v89_v39 }
  0x5b   :  { %564 = vmatpush1.bf16.xpose.msra.mxu0 %v837_v43  ;;  %604 = vmatpush1.bf16.xpose.msra.mxu1 %v839_v32  ;;  %v784_v32 = vld [vmem:[%s1063_s2] ss:$0 sm:$0xff] }
  0x5c   :  { %565 = vmatprep.subr.bf16.mxu0 %v830_v44  ;;  %605 = vmatprep.subr.bf16.mxu1 %v832_v45 }
  0x63   :  { %566 = vmatpush1.bf16.xpose.msra.mxu0 %v829_v50  ;;  %606 = vmatpush1.bf16.xpose.msra.mxu1 %v831_v51 }
  0x64   :  { %567 = vmatprep.subr.bf16.mxu0 %v822_v52  ;;  %607 = vmatprep.subr.bf16.mxu1 %v824_v53 }
  0x6b   :  { %568 = vmatpush1.bf16.xpose.msra.mxu0 %v821_v58  ;;  %608 = vmatpush1.bf16.xpose.msra.mxu1 %v823_v59 }
  0x6c   :  { %569 = vmatprep.subr.bf16.mxu0 %v814_v60  ;;  %609 = vmatprep.subr.bf16.mxu1 %v816_v61 }
  0x73   :  { %570 = vmatpush1.bf16.xpose.msra.mxu0 %v813_v2  ;;  %610 = vmatpush1.bf16.xpose.msra.mxu1 %v815_v3 }
  0x74   :  { %571 = vmatprep.subr.bf16.mxu0 %v806_v4  ;;  %611 = vmatprep.subr.bf16.mxu1 %v808_v5 }
  0x7b   :  { %572 = vmatpush1.bf16.xpose.msra.mxu0 %v805_v10  ;;  %612 = vmatpush1.bf16.xpose.msra.mxu1 %v807_v11 }
  0x7c   :  { %573 = vmatprep.subr.bf16.mxu0 %v798_v12  ;;  %613 = vmatprep.subr.bf16.mxu1 %v800_v13 }
  0x83   :  { %574 = vmatpush1.bf16.xpose.msra.mxu0 %v797_v18  ;;  %614 = vmatpush1.bf16.xpose.msra.mxu1 %v799_v19 }
  0x84   :  { %575 = vmatprep.subr.bf16.mxu0 %v790_v20  ;;  %615 = vmatprep.subr.bf16.mxu1 %v792_v21 }
  0x8b   :  { %576 = vmatpush1.bf16.xpose.msra.mxu0 %v789_v25  ;;  %616 = vmatpush1.bf16.xpose.msra.mxu1 %v791_v26 }
  0x8c   :  { %867 = vmatprep.subr.bf16.mxu0 %v956_v31 }
  0x92   :  { %594 = vmatmul.mubr.bf16.vlgmr.msra.gmra.mxu0 %v86_v27  ;;  %634 = vmatmul.mubr.bf16.vlgmr.msra.gmra.mxu1 %v88_v28 }
  0x93   :  { %868 = vmatpush3.bf16.xpose.msra.mxu0 %v896_v30  ;;  %883 = vmatprep.mubr.msk.bf16.mxu0 %vm957_vm0, %v956_v31 }
  0x94   :  { %869 = vmatprep.subr.bf16.mxu0 %v956_v31 }
  0x9b   :  { %870 = vmatpush3.bf16.xpose.msra.mxu0 %v897_v33 }
  0x9c   :  { %871 = vmatprep.subr.bf16.mxu0 %v956_v31 }
  0xa3   :  { %872 = vmatpush3.bf16.xpose.msra.mxu0 %v898_v22 }
  0xa4   :  { %873 = vmatprep.subr.bf16.mxu0 %v956_v31 }
  0xab   :  { %874 = vmatpush3.bf16.xpose.msra.mxu0 %v899_v24 }
  0xac   :  { %875 = vmatprep.subr.bf16.mxu0 %v956_v31 }
  0xb3   :  { %876 = vmatpush3.bf16.xpose.msra.mxu0 %v900_v23 }
  0xb4   :  { %877 = vmatprep.subr.bf16.mxu0 %v956_v31 }
  0xbb   :  { %878 = vmatpush3.bf16.xpose.msra.mxu0 %v901_v34 }
  0xbc   :  { %879 = vmatprep.subr.bf16.mxu0 %v956_v31 }
  0xc3   :  { %880 = vmatpush3.bf16.xpose.msra.mxu0 %v902_v35 }
  0xc4   :  { %881 = vmatprep.subr.bf16.mxu0 %v956_v31 }
  0xcb   :  { %882 = vmatpush3.bf16.xpose.msra.mxu0 %v903_v36 }
 0x112   :  { %v515_v37 = vpop.f32.mrf.mxu0  ;;  %v555_v38 = vpop.f32.mrf.mxu1 }
 0x113   :  { %v516_v44 = vadd.f32 %v784_v32, %v515_v37 }
 0x114   :  { %v517_v39 = vpop.f32.mrf.mxu0  ;;  %v557_v29 = vpop.f32.mrf.mxu1 }
 0x115   :  { %v556_v45 = vadd.f32 %v555_v38, %v516_v44 }
 0x116   :  { %v518_v40 = vpop.f32.mrf.mxu0  ;;  %v558_v41 = vpop.f32.mrf.mxu1 }
 0x118   :  { %v519_v42 = vpop.f32.mrf.mxu0  ;;  %v559_v43 = vpop.f32.mrf.mxu1 }
 0x152   :  { %v595_v46 = vpop.f32.mrf.mxu0  ;;  %v635_v48 = vpop.f32.mrf.mxu1 }
 0x153   :  { %v596_v47 = vadd.f32 %v595_v46, %v556_v45 }
 0x154   :  { %v597_v49 = vpop.f32.mrf.mxu0  ;;  %v637_v51 = vpop.f32.mrf.mxu1 }
 0x155   :  { %v636_v50 = vadd.f32 %v635_v48, %v596_v47 }
 0x156   :  { %v598_v52 = vpop.f32.mrf.mxu0  ;;  %v638_v54 = vpop.f32.mrf.mxu1 }
 0x157   :  { %v641_v53 = vand.u32 2147483647, %v636_v50  ;;  %v654_v3 = vmax.f32 %v636_v50, 0.0 }
 0x158   :  { %v599_v55 = vpop.f32.mrf.mxu0  ;;  %v639_v57 = vpop.f32.mrf.mxu1 }
 0x159   :  { %v642_v56 = vsub.f32 0.0, %v641_v53 }
 0x15b   :  { %v643_v58 = vmul.f32 1.442695, %v642_v56 }
 0x15d   :  { %904 = vpow2.f32 %v643_v58 }
 0x16a   :  { %v905_v59 = vpop.eup %904 }
 0x16b   :  { %v645_v60 = vadd.f32 1.0, %v905_v59  ;;  %v648_v61 = vmul.f32 -0.5, %v905_v59  ;;  %v651_v63 = vand.u32 2147483647, %v905_v59 }
 0x16d   :  { %906 = vlog2.f32 %v645_v60  ;;  %v649_v62 = vadd.f32 1.0, %v648_v61  ;;  %vm652_vm1 = vcmp.lt.f32.partialorder %v651_v63, 0.0004427343 }
 0x16f   :  { %v650_v2 = vmul.f32 %v905_v59, %v649_v62 }
 0x17a   :  { %v907_v0 = vpop.eup %906 }
 0x17b   :  { %v647_v1 = vmul.f32 0.6931472, %v907_v0 }
 0x17d   :  { %v653_v4 = vsel %vm652_vm1, %v650_v2, %v647_v1 }
 0x17e   :  { %v655_v5 = vadd.f32 %v654_v3, %v653_v4 }
 0x180   :  { %v656_v6 = vpack.c.bf16 %v655_v5, %v655_v5 }
 0x182   :  { %884 = vmatmul.mubr.bf16.vlgmr.msra.gmra.mxu0 %v656_v6 }
 0x242   :  { %v762_v8 = vpop.f32.mrf.mxu0 }
 0x243   :  { %v763_v9 = vadd.f32 %v849_v7, %v762_v8 }
 0x244   :  { %v885_v10 = vpop.f32.mrf.mxu0 }
 0x245   :  { %768 = vst [vmem:[#allocation5] sm:$0x3] %v763_v9 }
 0x246   :  { %v765_v11 = vpop.f32.mrf.mxu0 }
 0x247   :  { %939 = shalt.err (!%p936_p9)
}
 0x248   :  { %778 = dma.vmem_to_hbm [thread:$0]  %s776_s21, 32, %s1066_s5, [#allocation4]   ;;  %v886_v12 = vpop.f32.mrf.mxu0 }
 0x249   :  { %950 = dma.done.wait [#allocation4], 32  }
 0x24a   :  { %951 = vsyncadd [#allocation4], 4294967264 }
 0x24b   :  { %782 = vsyncpa [#allocation3], 1 }
 0x24c   :  { %783 = vsyncpa [#allocation4], 1 }

</bundles_post_ra>
